<compile_context>
chip_gen: v6e
topology: v6e:2x2x1
jax: 0.10.0
libtpu: 0.0.40
codegen_flags: <defaults>
</compile_context>

<pallas_src>
import functools

import jax
import jax.numpy as jnp
from jax.experimental import pallas as pl
from jax.experimental.pallas import tpu as pltpu

_INV_SQRT2 = 0.7071067811865476


def _glu_kernel(x_ref, o_ref, *, nc, act):
    # x_ref: (tile_m, 2*nc), o_ref: (tile_m, nc)
    x = x_ref[...]
    a = x[:, :nc]
    b = x[:, nc:].astype(jnp.float32)  # activation in f32 for accuracy; the op is
                                       # DMA-bound so this VPU cast is hidden under HBM.
    if act == "gelu":          # exact erf GELU == torch.nn.GELU() default
        g = 0.5 * b * (1.0 + jax.lax.erf(b * _INV_SQRT2))
    elif act == "gelu_tanh":   # tanh approximation (single EUP slot; cheaper on v5e)
        g = jax.nn.gelu(b, approximate=True)
    elif act == "sigmoid":     # classic GLU gate
        g = jax.nn.sigmoid(b)
    else:
        raise ValueError(f"unsupported act_layer: {act}")
    o_ref[...] = (a.astype(jnp.float32) * g).astype(o_ref.dtype)


def glu_pallas(x, *, act="gelu", tile_m=None):
    """x: (B, N, C) -> (B, N, C // 2) ;  out = x[..., :C//2] * act(x[..., C//2:])."""
    B, N, C = x.shape
    assert C % 2 == 0, "channels dont divide 2!"
    nc = C // 2
    M = B * N
    x2d = x.reshape(M, C)

    # Sublane granularity: 8 rows for 32-bit dtypes, 16 for 16-bit (packed) dtypes.
    sub = 16 if x.dtype.itemsize == 2 else 8

    if tile_m is None:
        # ~512-row tile sweet spot, capped so one x tile stays <= ~4 MiB; with default
        # double-buffering of input + output this fits the scoped-VMEM budget on all of
        # v5e / v6e / v7x (64 MiB physical) with plenty of headroom.
        budget_rows = max(sub, (4 * 1024 * 1024) // max(1, C * x.dtype.itemsize))
        tile_m = min(512, budget_rows)
    tile_m = max(sub, ((tile_m + sub - 1) // sub) * sub)   # enforce sublane multiple
    m_pad_unit = ((M + sub - 1) // sub) * sub
    tile_m = min(tile_m, m_pad_unit)                       # never exceed (padded) M

    grid_m = pl.cdiv(M, tile_m)
    M_pad = grid_m * tile_m
    if M_pad != M:
        # Pad the remainder tile instead of asserting divisibility.
        x2d = jnp.pad(x2d, ((0, M_pad - M), (0, 0)))

    kernel = functools.partial(_glu_kernel, nc=nc, act=act)

    out2d = pl.pallas_call(
        kernel,
        out_shape=jax.ShapeDtypeStruct((M_pad, nc), x.dtype),
        grid_spec=pltpu.PrefetchScalarGridSpec(
            num_scalar_prefetch=0,
            grid=(grid_m,),
            in_specs=[pl.BlockSpec((tile_m, C), lambda i: (i, 0))],
            out_specs=pl.BlockSpec((tile_m, nc), lambda i: (i, 0)),
        ),
        compiler_params=pltpu.CompilerParams(
            # Row tiles are independent -> megacore split across the 2 TCs on v7x.
            dimension_semantics=("parallel",),
        ),
    )(x2d)

    if M_pad != M:
        out2d = out2d[:M]
    return out2d.reshape(B, N, nc)


def glu_reference(x, *, act="gelu"):
    """Pure-JAX reference of the torch forward."""
    nc = x.shape[2] // 2
    a = x[:, :, :nc]
    b = x[:, :, nc:].astype(jnp.float32)
    if act == "gelu":
        g = 0.5 * b * (1.0 + jax.lax.erf(b * _INV_SQRT2))
    elif act == "gelu_tanh":
        g = jax.nn.gelu(b, approximate=True)
    else:
        g = jax.nn.sigmoid(b)
    return (a.astype(jnp.float32) * g).astype(x.dtype)


if __name__ == "__main__":
    # Small ViT-token-like shape: (batch, seq, channels); channels must be even.
    B, N, C = 2, 8, 32
    key = jax.random.PRNGKey(0)
    x = jax.random.normal(key, (B, N, C), dtype=jnp.float32)

    out = glu_pallas(x, act="gelu")   # act_layer() == nn.GELU() in the ViT model
    out = jax.block_until_ready(out)
    ref = glu_reference(x, act="gelu")

    assert out.shape == (B, N, C // 2)
    assert jnp.allclose(out, ref, atol=1e-5, rtol=1e-5), "mismatch vs reference"
    print("KERNEL_OK")
</pallas_src>

<mosaic_0001>
module attributes {stable_mosaic.version = 11 : i64} {
  func.func @_glu_kernel(%arg0: i32, %arg1: memref<16x32xf32, #tpu.memory_space<vmem>>, %arg2: memref<16x16xf32, #tpu.memory_space<vmem>>) attributes {dimension_semantics = [#tpu.dimension_semantics<parallel>], iteration_bounds = array<i64: 1>, scalar_prefetch = 0 : i64, scratch_operands = 0 : i64, tpu.core_type = #tpu.core_type<tc>, window_params = [{transform_indices = @transform_0, window_bounds = array<i64: 16, 32>}, {transform_indices = @transform_1, window_bounds = array<i64: 16, 16>}]} {
    %c0 = arith.constant 0 : index
    %c0_0 = arith.constant 0 : index
    %0 = vector.load %arg1[%c0, %c0_0] : memref<16x32xf32, #tpu.memory_space<vmem>>, vector<16x32xf32>
    %1 = vector.extract_strided_slice %0 {offsets = [0, 0], sizes = [16, 16], strides = [1, 1]} : vector<16x32xf32> to vector<16x16xf32>
    %2 = vector.extract_strided_slice %0 {offsets = [0, 16], sizes = [16, 16], strides = [1, 1]} : vector<16x32xf32> to vector<16x16xf32>
    %cst = arith.constant 5.000000e-01 : f32
    %3 = vector.broadcast %cst : f32 to vector<16x16xf32>
    %4 = arith.mulf %3, %2 : vector<16x16xf32>
    %cst_1 = arith.constant 0.707106769 : f32
    %5 = vector.broadcast %cst_1 : f32 to vector<16x16xf32>
    %6 = arith.mulf %2, %5 : vector<16x16xf32>
    %7 = math.erf %6 : vector<16x16xf32>
    %cst_2 = arith.constant 1.000000e+00 : f32
    %8 = vector.broadcast %cst_2 : f32 to vector<16x16xf32>
    %9 = arith.addf %8, %7 : vector<16x16xf32>
    %10 = arith.mulf %4, %9 : vector<16x16xf32>
    %11 = arith.mulf %1, %10 : vector<16x16xf32>
    %c0_3 = arith.constant 0 : index
    %c0_4 = arith.constant 0 : index
    %12 = vector.load %arg2[%c0_3, %c0_4] : memref<16x16xf32, #tpu.memory_space<vmem>>, vector<16x16xf32>
    tpu.vector_store %arg2[%c0_3, %c0_4], %11 {strides = array<i32>} : memref<16x16xf32, #tpu.memory_space<vmem>>, vector<16x16xf32>,
    return
  }
  func.func @transform_0(%arg0: i32) -> (i32, i32) {
    %c0_i32 = arith.constant 0 : i32
    %c0_i32_0 = arith.constant 0 : i32
    return %arg0, %c0_i32 : i32, i32
  }
  func.func @transform_1(%arg0: i32) -> (i32, i32) {
    %c0_i32 = arith.constant 0 : i32
    %c0_i32_0 = arith.constant 0 : i32
    return %arg0, %c0_i32 : i32, i32
  }
}

</mosaic_0001>

<bundles_post_ra>
// kernel: tpu_custom_call.1
= control target key start
LH: loop header
LB: loop body
LE: loop exit
PB: predicated region body
PF: predicated region fallthrough
CT: control target
= control target key end

     0   :  { %6 = vsyncpa [#allocation3], 0  ;;  %s145_s0 = inlined_call_operand.hbm [shape: f32[16,32], index: 0, kind: input, shape index: {}]   ;;  %s146_s1 = inlined_call_operand.hbm [shape: f32[16,16], index: 1, kind: output, shape index: {}]  }
   0x1   :  { %7 = vsyncpa [#allocation4], 0  ;;  %s118_s6 = smov [#allocation2]  }
   0x2   :  { %s13_s7 = sshll.u32 %s118_s6, 4  ;;  %s14_s7 = int_to_ptr.vmem [resolvable:$true] %s13_s7 }
   0x3   :  { %s82_s8 = scalar_lea.vmem %s14_s7, 256  ;;  %p87_p1 = scmp.lt.s32.totalorder %s14_s7, %s14_s7 }
   0x4   :  { %p83_p0 = scmp.ne.s32.totalorder %s14_s7, %s82_s8  ;;  %p88_p2 = scmp.lt.s32.totalorder %s82_s8, %s82_s8 }
   0x6   :  { %p89_p3 = por %p88_p2, %p87_p1 }
   0x8   :  { %p90_p4 = pnand %p89_p3, %p83_p0 }
   0xa   :  { %93 = shalt.err (!%p90_p4)
}
   0xb   :  { %s119_s9 = smov 128   ;;  %s120_s10 = smov 8  }
   0xc   :  { %19 = dma.hbm_to_vmem [thread:$0]  %s145_s0, 256, %s14_s7, [#allocation3], %s119_s9, %s119_s9, %s120_s10  }
   0xd   :  { %114 = dma.done.wait [#allocation3], 256  }
   0xe   :  { %115 = vsyncadd [#allocation3], 4294967040  ;;  %v23_v0 = vld [vmem:[#allocation2] sm:$0xff]  ;;  %v24_v1 = vld [vmem:[#allocation2 + $0x8] sm:$0xff]  ;;  %s121_s13 = smov 112   ;;  %vm45_vm0 = vcmask 130048  }
   0xf   :  { %v27_v2 = vmul.f32 0.70710677, %v23_v0  ;;  %v28_v3 = vmul.f32 0.70710677, %v24_v1  ;;  %v25_v4 = vmul.f32 0.5, %v23_v0  ;;  %v26_v8 = vmul.f32 0.5, %v24_v1 }
  0x10   :  { %s122_s0 = smov [#allocation5]  }
  0x11   :  { %70 = verf.f32 %v27_v2  ;;  %s53_s14 = sshll.u32 %s122_s0, 4  ;;  %s54_s14 = int_to_ptr.vmem [resolvable:$true] %s53_s14 }
  0x12   :  { %72 = verf.f32 %v28_v3  ;;  %s94_s15 = scalar_lea.vmem %s54_s14, 256  ;;  %p99_p6 = scmp.lt.s32.totalorder %s54_s14, %s54_s14 }
  0x13   :  { %p95_p5 = scmp.ne.s32.totalorder %s54_s14, %s94_s15  ;;  %p100_p7 = scmp.lt.s32.totalorder %s94_s15, %s94_s15 }
  0x15   :  { %p101_p8 = por %p100_p7, %p99_p6 }
  0x17   :  { %p102_p9 = pnand %p101_p8, %p95_p5 }
  0x1e   :  { %v71_v5 = vpop.eup %70 }
  0x1f   :  { %v73_v6 = vpop.eup %72  ;;  %v31_v7 = vadd.f32 1.0, %v71_v5 }
  0x20   :  { %v32_v9 = vadd.f32 1.0, %v73_v6 }
  0x21   :  { %v33_v10 = vmul.f32 %v31_v7, %v25_v4 }
  0x22   :  { %v34_v11 = vmul.f32 %v32_v9, %v26_v8 }
  0x23   :  { %37 = vrot.lane.b32.xlu0 %v33_v10, %s121_s13 }
  0x27   :  { %39 = vrot.lane.b32.xlu0 %v34_v11, %s121_s13 }
  0x95   :  { %v38_v12 = vpop.permute.xlu0 %37 }
  0x96   :  { %v43_v13 = vmul.f32 %v38_v12, %v23_v0 }
  0x98   :  { %46 = vst.msk [vmem:[#allocation5] sm:$0xff] %vm45_vm0, %v43_v13 }
  0x99   :  { %v40_v14 = vpop.permute.xlu0 %39 }
  0x9a   :  { %v44_v15 = vmul.f32 %v40_v14, %v24_v1 }
  0x9c   :  { %47 = vst.msk [vmem:[#allocation5 + $0x8] sm:$0xff] %vm45_vm0, %v44_v15 }
  0x9d   :  { %105 = shalt.err (!%p102_p9)
}
  0x9e   :  { %59 = dma.vmem_to_hbm [thread:$0]  %s54_s14, 256, %s146_s1, [#allocation4], %s119_s9, %s119_s9, %s120_s10  }
  0x9f   :  { %116 = dma.done.wait [#allocation4], 256  }
  0xa0   :  { %117 = vsyncadd [#allocation4], 4294967040 }
  0xa1   :  { %63 = vsyncpa [#allocation3], 1 }
  0xa2   :  { %64 = vsyncpa [#allocation4], 1 }

</bundles_post_ra>
